<compile_context>
chip_gen: v5e
topology: v5e:2x2
jax: 0.10.0
libtpu: 0.0.40
codegen_flags: <defaults>
</compile_context>

<pallas_src>
import functools

import jax
import jax.numpy as jnp
from jax.experimental import pallas as pl
from jax.experimental.pallas import tpu as pltpu

PAIRWISE_EPS = 1e-6  # F.pairwise_distance default eps
_MIB = 1024 * 1024


def _cdiv(a, b):
    return -(-a // b)


def _round_up(x, m):
    return _cdiv(x, m) * m


def _sublane_granule(itemsize):
    # Native second-minor tile: 8 rows (f32), 16 (bf16/f16), 32 (int8/fp8).
    return {4: 8, 2: 16, 1: 32}.get(int(itemsize), 8)


def _tpu_vmem_capacity_bytes():
    try:
        info = pltpu.get_tpu_info()
        cap = getattr(info, "vmem_capacity_bytes", None)
        if cap:
            return int(cap)
    except Exception:
        pass
    return 64 * _MIB  # conservative fallback (v7x-class physical size)


def _device_kind():
    try:
        return jax.devices()[0].device_kind.lower().replace(" ", "")
    except Exception:
        return ""


def _tpu_num_tensorcores():
    """2 on dual-TensorCore / megacore parts (v7x, v4, v5p), else 1."""
    kind = _device_kind()
    if any(t in kind for t in ("v5lite", "v5e", "v6lite", "v6e", "v2", "v3")):
        return 1  # single TensorCore: outer 'parallel' split is pure overhead
    if any(t in kind for t in ("v7", "7x", "v5p", "v5", "v4")):
        return 2
    return 1      # unknown part: safe default (correct on anything)


def _vmem_budgets():
    """(per-step pipelined tile budget bytes, explicit vmem_limit_bytes)."""
    phys = _tpu_vmem_capacity_bytes()
    kind = _device_kind()
    if phys <= 64 * _MIB or "v7" in kind or "7x" in kind:
        # v7x-class (64 MiB physical VMEM) or unknown chip: stay well inside.
        return 36 * _MIB, 46 * _MIB
    # v5e / v6e / v5p / v4 (128 MiB physical): raise the scoped limit past the
    # 16/32 MiB defaults and spend it on bigger tiles.
    return 60 * _MIB, 84 * _MIB


def _bytes_per_row(d, itemsize):
    """Pipelined VMEM bytes per batch row for one grid step."""
    d_pad = _round_up(d, 128)            # lane padding of the feature blocks
    feat = 2 * 2 * d_pad * itemsize      # 2 inputs x 2 pipeline buffers
    interm = 3 * d_pad * 4               # in-flight f32 temporaries (upcast/diff/diff^2)
    lbl = 2 * 128 * 4                    # 128-lane-padded f32 label block x 2 buffers
    return feat + interm + lbl


def _contrastive_loss_kernel(o1_ref, o2_ref, lbl_ref, acc_ref, *,
                             margin, n_rows, tile_n, tiles_per_chunk):
    p = pl.program_id(0)   # "parallel" chunk axis (TensorCore sharding on v7x)
    t = pl.program_id(1)   # "arbitrary" tile-within-chunk axis (accumulation)

    @pl.when(t == 0)
    def _init():
        acc_ref[...] = jnp.zeros_like(acc_ref)

    # bf16 inputs are upcast in-register; HBM traffic stays at the input dtype.
    o1 = o1_ref[...].astype(jnp.float32)      # (tile_n, D)
    o2 = o2_ref[...].astype(jnp.float32)      # (tile_n, D)
    lbl = lbl_ref[...].astype(jnp.float32)    # (tile_n, 1)

    # torch F.pairwise_distance: ||o1 - o2 + eps||_2 along the feature dim.
    diff = (o1 - o2) + PAIRWISE_EPS
    sq_sum = jnp.sum(diff * diff, axis=-1, keepdims=True)   # d^2   (tile_n, 1)
    dist = jnp.sqrt(sq_sum)                                  # d (EUP slot)
    hinge = jnp.maximum(margin - dist, 0.0)

    # label * d^2 uses sq_sum directly (no sqrt -> square round trip).
    loss = 0.5 * (lbl * sq_sum + (1.0 - lbl) * (hinge * hinge))   # (tile_n, 1)

    # Mask rows past the true batch size (ragged last tile + any padded grid
    # slot whose block index was clamped). jnp.where is a select, so garbage /
    # NaN padding rows contribute exactly 0.
    tile_idx = p * tiles_per_chunk + t
    row = jax.lax.broadcasted_iota(jnp.int32, (tile_n, 1), 0)
    valid = (tile_idx * tile_n + row) < n_rows

    # Reduce the tile to a single partial sum and accumulate it into the
    # resident lane-dense (1, 8, 128) block (every element holds the running
    # chunk sum -> unmasked full-tile writeback).
    tile_sum = jnp.sum(jnp.where(valid, loss, 0.0), keepdims=True)  # (1, 1)
    acc_ref[...] += tile_sum


def contrastive_loss(output1, output2, label, *, margin=2.0, tile_n=None):
    N, D = output1.shape
    itemsize = jnp.dtype(output1.dtype).itemsize
    granule = _sublane_granule(itemsize)
    tile_budget, vmem_limit = _vmem_budgets()
    num_tc = _tpu_num_tensorcores()

    label2d = jnp.reshape(label, (N, 1)).astype(jnp.float32)
    # TODO(synk): lane-dense (1, tile_n) label layout and small-D lane packing
    # ((N, D) -> (N/g, g*D) when D << 128) would trim the remaining lane-padded
    # label VMEM; secondary to the VMEM/chunk/accumulator fixes applied here.

    if tile_n is None:
        cap = tile_budget // _bytes_per_row(D, itemsize)
        cap = max(granule, (cap // granule) * granule)
        cap = min(cap, 32768)
    else:
        cap = max(granule, (int(tile_n) // granule) * granule)

    if N <= cap:
        tn = N                        # single full-array block: always legal
        num_tiles = 1
        num_chunks = 1
    else:
        num_tiles = _cdiv(N, cap)
        num_chunks = 2 if (num_tc >= 2 and num_tiles >= 2) else 1
        if num_chunks > 1:
            # Prefer a tile count divisible by num_chunks: balanced TensorCores
            # and (usually) no padded grid slot.
            num_tiles = _round_up(num_tiles, num_chunks)
        tn = min(cap, _round_up(_cdiv(N, num_tiles), granule))
        num_tiles = _cdiv(N, tn)

    tiles_per_chunk = _cdiv(num_tiles, num_chunks)
    last_block = num_tiles - 1

    def row_block(p, t):
        # Clamp so a padded (p, t) grid slot never indexes past the array end;
        # its rows are zeroed by the in-kernel mask anyway.
        return jnp.minimum(p * tiles_per_chunk + t, last_block)

    kernel = functools.partial(
        _contrastive_loss_kernel,
        margin=float(margin), n_rows=N, tile_n=tn,
        tiles_per_chunk=tiles_per_chunk)

    partials = pl.pallas_call(
        kernel,
        out_shape=jax.ShapeDtypeStruct((num_chunks, 8, 128), jnp.float32),
        grid_spec=pltpu.PrefetchScalarGridSpec(
            num_scalar_prefetch=0,
            grid=(num_chunks, tiles_per_chunk),
            in_specs=[
                pl.BlockSpec((tn, D), lambda p, t: (row_block(p, t), 0)),
                pl.BlockSpec((tn, D), lambda p, t: (row_block(p, t), 0)),
                pl.BlockSpec((tn, 1), lambda p, t: (row_block(p, t), 0)),
            ],
            out_specs=pl.BlockSpec((1, 8, 128), lambda p, t: (p, 0, 0)),
        ),
        compiler_params=pltpu.CompilerParams(
            dimension_semantics=("parallel", "arbitrary"),
            vmem_limit_bytes=int(vmem_limit)),
    )(output1, output2, label2d)

    # Each chunk block holds its partial sum in every element; combining the
    # num_chunks scalars is the only wrapper-side reduction left.
    return jnp.sum(partials[:, 0, 0])


def contrastive_loss_ref(output1, output2, label, *, margin=2.0):
    # Pure-JAX reference for sanity check.
    o1 = output1.astype(jnp.float32)
    o2 = output2.astype(jnp.float32)
    diff = o1 - o2 + PAIRWISE_EPS
    dist = jnp.sqrt(jnp.sum(diff * diff, axis=-1))
    s1 = label * dist ** 2
    s2 = (1.0 - label) * jnp.maximum(margin - dist, 0.0) ** 2
    return jnp.sum((s1 + s2) / 2.0)


if __name__ == "__main__":
    key = jax.random.PRNGKey(0)
    k1, k2, k3 = jax.random.split(key, 3)

    # Case 1: small batch, single-tile path (auto tile sizing).
    N, D = 8, 32
    o1 = jax.random.normal(k1, (N, D), dtype=jnp.float32)
    o2 = jax.random.normal(k2, (N, D), dtype=jnp.float32)
    lbl = jax.random.bernoulli(k3, 0.5, (N,)).astype(jnp.float32)

    loss = contrastive_loss(o1, o2, lbl)
    jax.block_until_ready(loss)
    ref = contrastive_loss_ref(o1, o2, lbl)
    assert jnp.allclose(loss, ref, rtol=1e-5, atol=1e-5), (loss, ref)

    # Case 2: multi-tile grid + ragged tail (forced small tile, f32).
    N2, D2 = 20, 32
    o1b = jax.random.normal(k1, (N2, D2), dtype=jnp.float32)
    o2b = jax.random.normal(k2, (N2, D2), dtype=jnp.float32)
    lblb = jax.random.bernoulli(k3, 0.5, (N2,)).astype(jnp.float32)

    loss2 = contrastive_loss(o1b, o2b, lblb, tile_n=8)
    jax.block_until_ready(loss2)
    ref2 = contrastive_loss_ref(o1b, o2b, lblb)
    assert jnp.allclose(loss2, ref2, rtol=1e-5, atol=1e-5), (loss2, ref2)

    # Case 3: bf16 feature inputs (in-register upcast; tile rounded to the
    # bf16 sublane granule of 16 even though 8 was requested).
    o1c = o1b.astype(jnp.bfloat16)
    o2c = o2b.astype(jnp.bfloat16)
    loss3 = contrastive_loss(o1c, o2c, lblb, tile_n=8)
    jax.block_until_ready(loss3)
    ref3 = contrastive_loss_ref(o1c, o2c, lblb)
    assert jnp.allclose(loss3, ref3, rtol=1e-3, atol=1e-3), (loss3, ref3)

    print("KERNEL_OK")
</pallas_src>

<mosaic_0001>
module attributes {stable_mosaic.version = 11 : i64} {
  func.func @_contrastive_loss_kernel(%arg0: i32, %arg1: i32, %arg2: memref<8x32xf32, #tpu.memory_space<vmem>>, %arg3: memref<8x32xf32, #tpu.memory_space<vmem>>, %arg4: memref<8x1xf32, #tpu.memory_space<vmem>>, %arg5: memref<1x8x128xf32, #tpu.memory_space<vmem>>) attributes {dimension_semantics = [#tpu.dimension_semantics<parallel>, #tpu.dimension_semantics<arbitrary>], iteration_bounds = array<i64: 1, 1>, scalar_prefetch = 0 : i64, scratch_operands = 0 : i64, tpu.core_type = #tpu.core_type<tc>, window_params = [{transform_indices = @transform_0, window_bounds = array<i64: 8, 32>}, {transform_indices = @transform_1, window_bounds = array<i64: 8, 32>}, {transform_indices = @transform_2, window_bounds = array<i64: 8, 1>}, {transform_indices = @transform_3, window_bounds = array<i64: 1, 8, 128>}]} {
    %c0_i32 = arith.constant 0 : i32
    %0 = arith.cmpi eq, %arg1, %c0_i32 : i32
    %1 = arith.extui %0 : i1 to i32
    %c0_i32_0 = arith.constant 0 : i32
    %2 = arith.cmpi ne, %1, %c0_i32_0 : i32
    scf.if %2 {
      %cst_20 = arith.constant 0.000000e+00 : f32
      %45 = vector.broadcast %cst_20 : f32 to vector<1x8x128xf32>
      %c0_21 = arith.constant 0 : index
      %c0_22 = arith.constant 0 : index
      %c0_23 = arith.constant 0 : index
      %46 = vector.load %arg5[%c0_21, %c0_22, %c0_23] : memref<1x8x128xf32, #tpu.memory_space<vmem>>, vector<1x8x128xf32>
      tpu.vector_store %arg5[%c0_21, %c0_22, %c0_23], %45 {strides = array<i32>} : memref<1x8x128xf32, #tpu.memory_space<vmem>>, vector<1x8x128xf32>,
    } else {
    }
    %c0 = arith.constant 0 : index
    %c0_1 = arith.constant 0 : index
    %3 = vector.load %arg2[%c0, %c0_1] : memref<8x32xf32, #tpu.memory_space<vmem>>, vector<8x32xf32>
    %c0_2 = arith.constant 0 : index
    %c0_3 = arith.constant 0 : index
    %4 = vector.load %arg3[%c0_2, %c0_3] : memref<8x32xf32, #tpu.memory_space<vmem>>, vector<8x32xf32>
    %c0_4 = arith.constant 0 : index
    %c0_5 = arith.constant 0 : index
    %5 = vector.load %arg4[%c0_4, %c0_5] : memref<8x1xf32, #tpu.memory_space<vmem>>, vector<8x1xf32>
    %6 = arith.subf %3, %4 : vector<8x32xf32>
    %cst = arith.constant 9.99999997E-7 : f32
    %7 = vector.broadcast %cst : f32 to vector<8x32xf32>
    %8 = arith.addf %6, %7 : vector<8x32xf32>
    %9 = arith.mulf %8, %8 : vector<8x32xf32>
    %cst_6 = arith.constant dense<0.000000e+00> : vector<8xf32>
    %10 = vector.multi_reduction <add>, %9, %cst_6 [1] : vector<8x32xf32> to vector<8xf32>
    %11 = vector.shape_cast %10 : vector<8xf32> to vector<8x1xf32>
    %12 = math.sqrt %11 : vector<8x1xf32>
    %cst_7 = arith.constant 2.000000e+00 : f32
    %13 = vector.broadcast %cst_7 : f32 to vector<8x1xf32>
    %14 = arith.subf %13, %12 : vector<8x1xf32>
    %cst_8 = arith.constant 0.000000e+00 : f32
    %15 = vector.broadcast %cst_8 : f32 to vector<8x1xf32>
    %16 = arith.maximumf %14, %15 : vector<8x1xf32>
    %17 = arith.mulf %5, %11 : vector<8x1xf32>
    %cst_9 = arith.constant 1.000000e+00 : f32
    %18 = vector.broadcast %cst_9 : f32 to vector<8x1xf32>
    %19 = arith.subf %18, %5 : vector<8x1xf32>
    %20 = arith.mulf %16, %16 : vector<8x1xf32>
    %21 = arith.mulf %19, %20 : vector<8x1xf32>
    %22 = arith.addf %17, %21 : vector<8x1xf32>
    %cst_10 = arith.constant 5.000000e-01 : f32
    %23 = vector.broadcast %cst_10 : f32 to vector<8x1xf32>
    %24 = arith.mulf %23, %22 : vector<8x1xf32>
    %c1_i32 = arith.constant 1 : i32
    %25 = arith.muli %arg0, %c1_i32 : i32
    %26 = arith.addi %25, %arg1 : i32
    %27 = tpu.iota {dimensions = array<i32: 0>} : vector<8x1xi32>
    %c8_i32 = arith.constant 8 : i32
    %28 = arith.muli %26, %c8_i32 : i32
    %29 = vector.broadcast %28 : i32 to vector<8x1xi32>
    %30 = arith.addi %29, %27 : vector<8x1xi32>
    %c8_i32_11 = arith.constant 8 : i32
    %31 = vector.broadcast %c8_i32_11 : i32 to vector<8x1xi32>
    %32 = arith.cmpi slt, %30, %31 : vector<8x1xi32>
    %cst_12 = arith.constant 0.000000e+00 : f32
    %33 = vector.broadcast %cst_12 : f32 to vector<8x1xf32>
    %34 = arith.select %32, %24, %33 : vector<8x1xi1>, vector<8x1xf32>
    %35 = vector.shape_cast %34 : vector<8x1xf32> to vector<1x8x1xf32>
    %cst_13 = arith.constant dense<0.000000e+00> : vector<1xf32>
    %36 = vector.multi_reduction <add>, %35, %cst_13 [1, 2] : vector<1x8x1xf32> to vector<1xf32>
    %37 = vector.shape_cast %36 : vector<1xf32> to vector<1x1x1xf32>
    %38 = vector.extract %37[0, 0, 0] : f32 from vector<1x1x1xf32>
    %39 = vector.broadcast %38 : f32 to vector<1x1xf32>
    %c0_14 = arith.constant 0 : index
    %c0_15 = arith.constant 0 : index
    %c0_16 = arith.constant 0 : index
    %40 = vector.load %arg5[%c0_14, %c0_15, %c0_16] : memref<1x8x128xf32, #tpu.memory_space<vmem>>, vector<1x8x128xf32>
    %41 = vector.shape_cast %39 : vector<1x1xf32> to vector<1x1x1xf32>
    %42 = vector.broadcast %41 : vector<1x1x1xf32> to vector<1x8x128xf32>
    %43 = arith.addf %40, %42 : vector<1x8x128xf32>
    %c0_17 = arith.constant 0 : index
    %c0_18 = arith.constant 0 : index
    %c0_19 = arith.constant 0 : index
    %44 = vector.load %arg5[%c0_17, %c0_18, %c0_19] : memref<1x8x128xf32, #tpu.memory_space<vmem>>, vector<1x8x128xf32>
    tpu.vector_store %arg5[%c0_17, %c0_18, %c0_19], %43 {strides = array<i32>} : memref<1x8x128xf32, #tpu.memory_space<vmem>>, vector<1x8x128xf32>,
    return
  }
  func.func @transform_0(%arg0: i32, %arg1: i32) -> (i32, i32) {
    %c1_i32 = arith.constant 1 : i32
    %0 = arith.muli %arg0, %c1_i32 : i32
    %1 = arith.addi %0, %arg1 : i32
    %c0_i32 = arith.constant 0 : i32
    %2 = arith.minsi %1, %c0_i32 : i32
    %c0_i32_0 = arith.constant 0 : i32
    %c0_i32_1 = arith.constant 0 : i32
    return %2, %c0_i32_0 : i32, i32
  }
  func.func @transform_1(%arg0: i32, %arg1: i32) -> (i32, i32) {
    %c1_i32 = arith.constant 1 : i32
    %0 = arith.muli %arg0, %c1_i32 : i32
    %1 = arith.addi %0, %arg1 : i32
    %c0_i32 = arith.constant 0 : i32
    %2 = arith.minsi %1, %c0_i32 : i32
    %c0_i32_0 = arith.constant 0 : i32
    %c0_i32_1 = arith.constant 0 : i32
    return %2, %c0_i32_0 : i32, i32
  }
  func.func @transform_2(%arg0: i32, %arg1: i32) -> (i32, i32) {
    %c1_i32 = arith.constant 1 : i32
    %0 = arith.muli %arg0, %c1_i32 : i32
    %1 = arith.addi %0, %arg1 : i32
    %c0_i32 = arith.constant 0 : i32
    %2 = arith.minsi %1, %c0_i32 : i32
    %c0_i32_0 = arith.constant 0 : i32
    %c0_i32_1 = arith.constant 0 : i32
    return %2, %c0_i32_0 : i32, i32
  }
  func.func @transform_3(%arg0: i32, %arg1: i32) -> (i32, i32, i32) {
    %c0_i32 = arith.constant 0 : i32
    %c0_i32_0 = arith.constant 0 : i32
    %c0_i32_1 = arith.constant 0 : i32
    return %arg0, %c0_i32, %c0_i32_0 : i32, i32, i32
  }
}

</mosaic_0001>

<bundles_post_ra>
// kernel: tpu_custom_call.1
= control target key start
LH: loop header
LB: loop body
LE: loop exit
PB: predicated region body
PF: predicated region fallthrough
CT: control target
= control target key end

     0   :  { %8 = vsyncpa [#allocation3], 0  ;;  %s273_s0 = inlined_call_operand.vmem [shape: f32[8,32], index: 0, kind: input, shape index: {}]   ;;  %s274_s1 = inlined_call_operand.hbm [shape: f32[8,32], index: 1, kind: input, shape index: {}]   ;;  %s275_s2 = inlined_call_operand.vmem [shape: f32[8,1], index: 2, kind: input, shape index: {}]   ;;  %s276_s3 = inlined_call_operand.hbm [shape: f32[1,8,128], index: 3, kind: output, shape index: {}]  }
   0x1   :  { %9 = vsyncpa [#allocation4], 0  ;;  %s32_s14 = sshll.u32 %s274_s1, 4  ;;  %s239_s15 = smov [#allocation2]   ;;  %s33_s14 = int_to_ptr.hbm [resolvable:$true] %s32_s14 }
   0x2   :  { %s34_s16 = sshll.u32 %s239_s15, 4  ;;  %s35_s16 = int_to_ptr.vmem [resolvable:$true] %s34_s16 }
   0x3   :  { %37 = dma.hbm_to_vmem [thread:$0]  %s33_s14, 128, %s35_s16, [#allocation3]  }
   0x4   :  { %235 = dma.done.wait [#allocation3], 128  }
   0x5   :  { %236 = vsyncadd [#allocation3], 4294967168  ;;  %v96_v0 = vld [vmem:[%s273_s0] sm:$0xff]  ;;  %vm102_vm0 = vcmask 261120   ;;  %vm134_vm3 = vcmask 7168   ;;  %s240_s19 = smov [#allocation5]  }
   0x6   :  { %v97_v1 = vld [vmem:[#allocation2] sm:$0xff]  ;;  %s156_s22 = sshll.u32 %s276_s3, 4  ;;  %s157_s22 = int_to_ptr.hbm [resolvable:$true] %s156_s22 }
   0x7   :  { %v99_v2 = vsub.f32 %v96_v0, %v97_v1  ;;  %v98_v18 = vld [vmem:[%s275_s2] sm:$0xff]  ;;  %s154_s2 = sshll.u32 %s240_s19, 4  ;;  %s155_s2 = int_to_ptr.vmem [resolvable:$true] %s154_s2 }
   0x8   :  { %v121_v20 = vsub.f32 1.0, %v98_v18 }
   0x9   :  { %v100_v3 = vadd.f32 1e-06, %v99_v2 }
   0xb   :  { %v101_v4 = vmul.f32 %v100_v3, %v100_v3 }
   0xd   :  { %v103_v5 = vsel %vm102_vm0, %v101_v4, 0.0 }
   0xe   :  { %104 = vadd.xlane.f32.xlu0 %v103_v5 }
  0x81   :  { %v105_v6 = vpop.xlane.xlu0 %104 }
  0x82   :  { %185 = vrsqrt.f32 %v105_v6  ;;  %vm113_vm1 = vcmp.eq.f32.partialorder %v105_v6, inf  ;;  %v116_v14 = vand.u32 2147483648, %v105_v6  ;;  %vm115_vm2 = vcmp.eq.f32.partialorder %v105_v6, 0.0 }
  0x83   :  { %v120_v22 = vmul.f32 %v105_v6, %v98_v18 }
  0x88   :  { %v186_v7 = vpop.eup %185 }
  0x89   :  { %v107_v8 = vmul.f32 %v186_v7, %v105_v6 }
  0x8b   :  { %v108_v9 = vmul.f32 %v186_v7, %v107_v8 }
  0x8d   :  { %v109_v10 = vmul.f32 0.5, %v108_v9 }
  0x8f   :  { %v110_v11 = vsub.f32 1.5, %v109_v10 }
  0x91   :  { %v111_v12 = vmul.f32 %v186_v7, %v110_v11 }
  0x93   :  { %v112_v13 = vmul.f32 %v111_v12, %v105_v6 }
  0x95   :  { %v114_v15 = vsel %vm113_vm1, %v105_v6, %v112_v13 }
  0x96   :  { %v117_v16 = vsel %vm115_vm2, %v116_v14, %v114_v15 }
  0x97   :  { %v118_v17 = vsub.f32 2.0, %v117_v16 }
  0x99   :  { %v119_v19 = vmax.f32 %v118_v17, 0.0 }
  0x9b   :  { %v122_v21 = vmul.f32 %v119_v19, %v119_v19 }
  0x9d   :  { %v123_v23 = vmul.f32 %v122_v21, %v121_v20 }
  0x9f   :  { %v124_v24 = vadd.f32 %v123_v23, %v120_v22 }
  0xa1   :  { %v125_v25 = vmul.f32 0.5, %v124_v24 }
  0xa3   :  { %v135_v26 = vsel %vm134_vm3, %v125_v25, 0.0 }
  0xa4   :  { %136 = vadd.xlane.f32.xlu0 %v135_v26 }
 0x117   :  { %v137_v27 = vpop.xlane.xlu0 %136 }
 0x118   :  { %v138_v28 = vrot.slane %v137_v27, 4 }
 0x11a   :  { %v139_v29 = vadd.f32 %v138_v28, %v137_v27 }
 0x11c   :  { %v140_v30 = vrot.slane %v139_v29, 2 }
 0x11e   :  { %v141_v31 = vadd.f32 %v140_v30, %v139_v29 }
 0x120   :  { %v142_v32 = vrot.slane %v141_v31, 1 }
 0x122   :  { %v143_v33 = vadd.f32 %v142_v32, %v141_v31 }
 0x124   :  { %180 = vpush %v143_v33 }
 0x155   :  { %s181_s23 = spop %180 }
 0x156   :  { %v146_v34 = vstv %s181_s23 }
 0x157   :  { %148 = vst [vmem:[#allocation5] sm:$0xff] %v146_v34 }
 0x158   :  { %159 = dma.vmem_to_hbm [thread:$0]  %s155_s2, 128, %s157_s22, [#allocation4]  }
 0x159   :  { %237 = dma.done.wait [#allocation4], 128  }
 0x15a   :  { %238 = vsyncadd [#allocation4], 4294967168 }
 0x15b   :  { %164 = vsyncpa [#allocation3], 1 }
 0x15c   :  { %165 = vsyncpa [#allocation4], 1 }

</bundles_post_ra>
